<compile_context>
chip_gen: v6e
topology: v6e:2x2x1
jax: 0.10.0
libtpu: 0.0.40
codegen_flags: <defaults>
</compile_context>

<pallas_src>
import jax
import jax.numpy as jnp
from jax import lax
from jax.experimental import pallas as pl
from jax.experimental.pallas import tpu as pltpu


def _lse_rows(lg):
    # Log-sum-exp along lanes (last axis) only — no sublane reductions.
    m = jnp.max(lg, axis=-1, keepdims=True)
    return m + jnp.log(jnp.sum(jnp.exp(lg - m), axis=-1, keepdims=True))


# ----------------------------------------------------------------------------
# Fused kernel: ITC loss + ID loss + accuracies, one dispatch.
#   scale     : (1,1) f32 SMEM          (logit_scale = 1/temperature)
#   cap       : [B, Lt]      i32 VMEM   (caption ids, for EOT argmax)
#   pids      : [B, 1]       i32 VMEM
#   icls      : [B, D]       VMEM       (image CLS token rows, input dtype)
#   txtf      : [B*Lt, D]    VMEM       (text tokens, pre-flattened)
#   w_t       : [D, C]  bf16 VMEM       (classifier weight, pre-transposed)
#   b         : [1, C]  f32  VMEM       (classifier bias row)
#   out       : (1, 4)  f32  SMEM       (itc_loss, id_loss, img_acc, txt_acc)
# ----------------------------------------------------------------------------
def _tirrs_fused_kernel(scale_ref, cap_ref, pid_ref, icls_ref, txtf_ref,
                        w_ref, b_ref, out_ref):
    scale = scale_ref[0, 0]

    # ---- EOT index (== caption_ids.argmax(-1), first-max tie-break) ---------
    cap = cap_ref[...]                                           # [B, Lt] i32
    B, Lt = cap.shape
    lt_iota = lax.broadcasted_iota(jnp.int32, (B, Lt), 1)
    cap_max = jnp.max(cap, axis=-1, keepdims=True)
    eot = jnp.min(jnp.where(cap == cap_max, lt_iota, Lt),
                  axis=-1, keepdims=True)                        # [B, 1]

    # ---- EOT gather as an MXU one-hot matmul (lane-only, no sublane reduce) -
    txt = txtf_ref[...]                                          # [B*Lt, D] (input dtype)
    BL = txt.shape[0]
    col = lax.broadcasted_iota(jnp.int32, (B, BL), 1)
    rowb = lax.broadcasted_iota(jnp.int32, (B, BL), 0)
    onehot_eot = (col == (rowb * Lt + eot)).astype(txt.dtype)    # [B, B*Lt]
    t_feats = lax.dot_general(onehot_eot, txt, (((1,), (0,)), ((), ())),
                              precision=lax.Precision.HIGHEST,
                              preferred_element_type=jnp.float32)  # [B, D] f32
    i_feats = icls_ref[...].astype(jnp.float32)                  # [B, D] f32

    # Stack image rows (0..B-1) and text rows (B..2B-1) once; reuse everywhere.
    feats = jnp.concatenate([i_feats, t_feats], axis=0)          # [2B, D] f32

    # ---- ITC: CLIP-style contrastive loss (stacked) --------------------------
    # L2 normalize rows (x / x.norm(dim=-1)); rsqrt -> single EUP op.
    n = feats * lax.rsqrt(jnp.sum(feats * feats, axis=-1, keepdims=True))
    ns = n * scale                                               # scale folded once
    dn = (((1,), (1,)), ((), ()))                                # contract last dims, no .T
    logits = lax.dot_general(ns, n, dimension_numbers=dn,
                             precision=lax.Precision.HIGHEST,
                             preferred_element_type=jnp.float32)  # [2B, 2B]
    # Keep only the cross-modality blocks (image rows x text cols and vice versa).
    r2 = lax.broadcasted_iota(jnp.int32, logits.shape, 0)
    c2 = lax.broadcasted_iota(jnp.int32, logits.shape, 1)
    cross = ((r2 < B) & (c2 >= B)) | ((r2 >= B) & (c2 < B))
    neg_inf = jnp.float32(-jnp.inf)
    lse_itc = _lse_rows(jnp.where(cross, logits, neg_inf))       # [2B, 1]
    # Matching-pair logit, computed directly in O(B*D).
    diag = jnp.sum(ns[:B] * n[B:], axis=-1, keepdims=True)       # [B, 1]
    diag2 = jnp.concatenate([diag, diag], axis=0)                # [2B, 1]
    # mean over 2B rows == 0.5 * (loss_i2t + loss_t2i)
    itc_loss = jnp.mean(lse_itc - diag2)

    # ---- ID: one stacked classifier matmul + CE + accuracies -----------------
    # PyTorch casts features with .half(); TPU MXU path uses bf16 here.
    feats_h = feats.astype(jnp.bfloat16)                         # [2B, D]
    logits_id = jnp.dot(feats_h, w_ref[...],
                        preferred_element_type=jnp.float32) + b_ref[...]   # [2B, C] f32

    pids = pid_ref[...]                                          # [B, 1] i32
    pids2 = jnp.concatenate([pids, pids], axis=0)                # [2B, 1]
    C = logits_id.shape[1]
    cls_iota = lax.broadcasted_iota(jnp.int32, (2 * B, C), 1)
    onehot_id = (cls_iota == pids2).astype(jnp.float32)          # [2B, C]

    lse_id = _lse_rows(logits_id)                                # [2B, 1]
    tgt = jnp.sum(logits_id * onehot_id, axis=-1, keepdims=True) # [2B, 1]
    # mean over 2B rows == 0.5 * (CE_img + CE_txt)  (== compute_id)
    id_loss = jnp.mean(lse_id - tgt)

    # TODO(synk): gate the accuracy reductions behind a logging flag at training
    # time if metrics are not consumed every step.
    mx = jnp.max(logits_id, axis=-1, keepdims=True)
    pred = jnp.min(jnp.where(logits_id == mx, cls_iota, C),
                   axis=-1, keepdims=True)                       # [2B, 1] (first-max)
    correct = (pred == pids2).astype(jnp.float32)                # [2B, 1]
    img_acc = jnp.mean(correct[:B])
    txt_acc = jnp.mean(correct[B:])

    out_ref[0, 0] = itc_loss
    out_ref[0, 1] = id_loss
    out_ref[0, 2] = img_acc
    out_ref[0, 3] = txt_acc


@jax.jit
def _tirrs_forward_fused(scale_arr, caption_ids, pids, image_feats, text_feats,
                         w_t_bf16, b_row):
    B, Li, D = image_feats.shape
    Lt = text_feats.shape[1]

    # Only the CLS token rows ever reach the kernel: B*D elements DMA'd instead
    # of B*Li*D. The slice lives inside this jitted program (no extra dispatch).
    i_cls = image_feats[:, 0, :]                                  # [B, D]
    # Contiguous reshape is free; enables the MXU one-hot EOT gather in-kernel.
    txt_flat = text_feats.reshape(B * Lt, D)                      # [B*Lt, D]
    cap = caption_ids.astype(jnp.int32)
    pids2d = pids.astype(jnp.int32).reshape(B, 1)

    out = pl.pallas_call(
        _tirrs_fused_kernel,
        out_shape=jax.ShapeDtypeStruct((1, 4), jnp.float32),
        in_specs=[
            pl.BlockSpec(memory_space=pltpu.MemorySpace.SMEM),   # scale (1,1)
            pl.BlockSpec(memory_space=pltpu.MemorySpace.VMEM),   # caption_ids [B,Lt]
            pl.BlockSpec(memory_space=pltpu.MemorySpace.VMEM),   # pids [B,1]
            pl.BlockSpec(memory_space=pltpu.MemorySpace.VMEM),   # image CLS rows [B,D]
            pl.BlockSpec(memory_space=pltpu.MemorySpace.VMEM),   # text tokens [B*Lt,D]
            pl.BlockSpec(memory_space=pltpu.MemorySpace.VMEM),   # w_t (bf16) [D,C]
            pl.BlockSpec(memory_space=pltpu.MemorySpace.VMEM),   # bias row [1,C]
        ],
        out_specs=pl.BlockSpec(memory_space=pltpu.MemorySpace.SMEM),
    )(scale_arr, cap, pids2d, i_cls, txt_flat, w_t_bf16, b_row)

    return out[0, 0], out[0, 1], out[0, 2], out[0, 3]


# ----------------------------------------------------------------------------
# TIRRS module (JAX/Pallas version) — task set 'itc+id'.
# ----------------------------------------------------------------------------
class TIRRSPallas:
    def __init__(self, embed_dim=32, num_classes=128, temperature=0.02,
                 loss_names="itc+id", id_loss_weight=1.0, key=None):
        self.embed_dim = embed_dim
        self.num_classes = num_classes
        self.id_loss_weight = id_loss_weight
        self.current_task = [l.strip() for l in loss_names.split("+")]
        print(f"Training Model with {self.current_task} tasks")
        # logit_scale = torch.ones([]) * (1 / temperature)
        self.logit_scale = 1.0 / temperature
        self.logit_scale_arr = jnp.full((1, 1), self.logit_scale, jnp.float32)
        # classifier: nn.Linear(embed_dim, num_classes), weight ~ N(0, 0.001), bias = 0
        key = jax.random.PRNGKey(42) if key is None else key
        self.classifier_w = (0.001 * jax.random.normal(
            key, (num_classes, embed_dim), dtype=jnp.float32))
        self.classifier_b = jnp.zeros((num_classes,), dtype=jnp.float32)
        # Precompute kernel-layout weights once (no per-step transpose/cast HLOs).
        # TODO(synk): bf16 stands in for PyTorch's .half() (fp16) classifier path.
        self.classifier_wT_bf16 = jnp.asarray(self.classifier_w.T, jnp.bfloat16)       # [D, C]
        self.classifier_b_row = self.classifier_b.reshape(1, -1).astype(jnp.float32)   # [1, C]
        # TODO(synk): base_model (CLIP), mlm cross-modal transformer, mim decoder
        # and the other loss branches (sdm/cmpm/ot/dl/cyclic/ss*) depend on
        # external modules/objectives not defined in this file.

    def forward(self, batch, epoch=0):
        ret = {}
        image_feats = batch["image_feats"]           # [B, L_i, D] (stand-in for base_model output)
        text_feats = batch["text_feats"]             # [B, L_t, D]
        caption_ids = batch["caption_ids"]           # [B, L_t]
        pids = batch["pids"]                         # [B]

        ret["temperature"] = jnp.asarray(1.0 / self.logit_scale, jnp.float32)

        # One fused (jitted) dispatch: CLS slice + text flatten + Pallas kernel
        # computing ITC loss, ID loss and accuracies.
        itc_loss, id_loss, img_acc, txt_acc = _tirrs_forward_fused(
            self.logit_scale_arr, caption_ids, pids, image_feats, text_feats,
            self.classifier_wT_bf16, self.classifier_b_row)

        if "itc" in self.current_task:
            ret["itc_loss"] = itc_loss
        if "id" in self.current_task:
            ret["id_loss"] = id_loss * self.id_loss_weight
            ret["img_acc"] = img_acc
            ret["txt_acc"] = txt_acc

        return ret


if __name__ == "__main__":
    B, Li, Lt, D, C = 8, 17, 16, 32, 128
    key = jax.random.PRNGKey(0)
    k_img, k_txt, k_ids, k_pid, k_w, k_im = jax.random.split(key, 6)

    batch = {
        # images kept NCHW as in PyTorch; only consumed by the external CLIP
        # base_model, so unused by the TIRRS-owned compute path here.
        "images": jax.random.normal(k_im, (B, 3, 64, 64), dtype=jnp.float32),
        "image_feats": jax.random.normal(k_img, (B, Li, D), dtype=jnp.float32),
        "text_feats": jax.random.normal(k_txt, (B, Lt, D), dtype=jnp.float32),
        "caption_ids": jax.random.randint(k_ids, (B, Lt), 0, 1000, dtype=jnp.int32),
        "pids": jax.random.randint(k_pid, (B,), 0, C, dtype=jnp.int32),
    }

    model = TIRRSPallas(embed_dim=D, num_classes=C, temperature=0.02,
                        loss_names="itc+id", id_loss_weight=1.0, key=k_w)

    ret = model.forward(batch, epoch=0)
    ret = jax.block_until_ready(ret)

    # sanity: all outputs finite
    for name, v in ret.items():
        assert bool(jnp.isfinite(v)), f"non-finite output: {name}"

    print("KERNEL_OK")
</pallas_src>

<mosaic_0001>
module attributes {stable_mosaic.version = 11 : i64} {
  func.func @_tirrs_fused_kernel(%arg0: memref<1x1xf32, #tpu.memory_space<smem>>, %arg1: memref<8x16xi32, #tpu.memory_space<vmem>>, %arg2: memref<8x1xi32, #tpu.memory_space<vmem>>, %arg3: memref<8x32xf32, #tpu.memory_space<vmem>>, %arg4: memref<128x32xf32, #tpu.memory_space<vmem>>, %arg5: memref<32x128xbf16, #tpu.memory_space<vmem>>, %arg6: memref<1x128xf32, #tpu.memory_space<vmem>>, %arg7: memref<1x4xf32, #tpu.memory_space<smem>>) attributes {dimension_semantics = [], scalar_prefetch = 0 : i64, scratch_operands = 0 : i64, tpu.core_type = #tpu.core_type<tc>} {
    %c0 = arith.constant 0 : index
    %c0_0 = arith.constant 0 : index
    %0 = memref.load %arg0[%c0, %c0_0] : memref<1x1xf32, #tpu.memory_space<smem>>
    %c0_1 = arith.constant 0 : index
    %c0_2 = arith.constant 0 : index
    %1 = vector.load %arg1[%c0_1, %c0_2] : memref<8x16xi32, #tpu.memory_space<vmem>>, vector<8x16xi32>
    %2 = tpu.iota {dimensions = array<i32: 1>} : vector<8x16xi32>
    %cst = arith.constant dense<-2147483648> : vector<8xi32>
    %3 = vector.multi_reduction <maxsi>, %1, %cst [1] : vector<8x16xi32> to vector<8xi32>
    %4 = vector.shape_cast %3 : vector<8xi32> to vector<8x1xi32>
    %5 = vector.broadcast %4 : vector<8x1xi32> to vector<8x16xi32>
    %6 = arith.cmpi eq, %1, %5 : vector<8x16xi32>
    %c16_i32 = arith.constant 16 : i32
    %7 = vector.broadcast %c16_i32 : i32 to vector<8x16xi32>
    %8 = arith.select %6, %2, %7 : vector<8x16xi1>, vector<8x16xi32>
    %cst_3 = arith.constant dense<2147483647> : vector<8xi32>
    %9 = vector.multi_reduction <minsi>, %8, %cst_3 [1] : vector<8x16xi32> to vector<8xi32>
    %10 = vector.shape_cast %9 : vector<8xi32> to vector<8x1xi32>
    %c0_4 = arith.constant 0 : index
    %c0_5 = arith.constant 0 : index
    %11 = vector.load %arg4[%c0_4, %c0_5] : memref<128x32xf32, #tpu.memory_space<vmem>>, vector<128x32xf32>
    %12 = tpu.iota {dimensions = array<i32: 1>} : vector<8x128xi32>
    %13 = tpu.iota {dimensions = array<i32: 0>} : vector<8x128xi32>
    %c16_i32_6 = arith.constant 16 : i32
    %14 = vector.broadcast %c16_i32_6 : i32 to vector<8x128xi32>
    %15 = arith.muli %13, %14 : vector<8x128xi32>
    %16 = vector.broadcast %10 : vector<8x1xi32> to vector<8x128xi32>
    %17 = arith.addi %15, %16 : vector<8x128xi32>
    %18 = arith.cmpi eq, %12, %17 : vector<8x128xi32>
    %19 = arith.extui %18 : vector<8x128xi1> to vector<8x128xi32>
    %20 = arith.sitofp %19 : vector<8x128xi32> to vector<8x128xf32>
    %cst_7 = arith.constant dense<0.000000e+00> : vector<8x32xf32>
    %21 = tpu.matmul %20, %11, %cst_7 {dimension_numbers = #tpu.dot_dimension_numbers<[1], [0], [0], [1], [0, 0, 1, 1], [], []>, precision = #tpu.contract_precision<fp32>} : vector<8x128xf32>, vector<128x32xf32>, vector<8x32xf32> -> vector<8x32xf32>
    %c0_8 = arith.constant 0 : index
    %c0_9 = arith.constant 0 : index
    %22 = vector.load %arg3[%c0_8, %c0_9] : memref<8x32xf32, #tpu.memory_space<vmem>>, vector<8x32xf32>
    %23 = tpu.concatenate %22, %21 in 0 : vector<8x32xf32>, vector<8x32xf32> -> vector<16x32xf32>
    %24 = arith.mulf %23, %23 : vector<16x32xf32>
    %cst_10 = arith.constant dense<0.000000e+00> : vector<16xf32>
    %25 = vector.multi_reduction <add>, %24, %cst_10 [1] : vector<16x32xf32> to vector<16xf32>
    %26 = vector.shape_cast %25 : vector<16xf32> to vector<16x1xf32>
    %27 = math.rsqrt %26 : vector<16x1xf32>
    %28 = vector.broadcast %27 : vector<16x1xf32> to vector<16x32xf32>
    %29 = arith.mulf %23, %28 : vector<16x32xf32>
    %30 = vector.broadcast %0 : f32 to vector<16x32xf32>
    %31 = arith.mulf %29, %30 : vector<16x32xf32>
    %cst_11 = arith.constant dense<0.000000e+00> : vector<16x16xf32>
    %32 = tpu.matmul %31, %29, %cst_11 {dimension_numbers = #tpu.dot_dimension_numbers<[1], [1], [0], [0], [0, 0, 1, 0], [], []>, precision = #tpu.contract_precision<fp32>} : vector<16x32xf32>, vector<16x32xf32>, vector<16x16xf32> -> vector<16x16xf32>
    %33 = tpu.iota {dimensions = array<i32: 0>} : vector<16x16xi32>
    %34 = tpu.iota {dimensions = array<i32: 1>} : vector<16x16xi32>
    %c8_i32 = arith.constant 8 : i32
    %35 = vector.broadcast %c8_i32 : i32 to vector<16x16xi32>
    %36 = arith.cmpi slt, %33, %35 : vector<16x16xi32>
    %c8_i32_12 = arith.constant 8 : i32
    %37 = vector.broadcast %c8_i32_12 : i32 to vector<16x16xi32>
    %38 = arith.cmpi sge, %34, %37 : vector<16x16xi32>
    %39 = arith.andi %36, %38 : vector<16x16xi1>
    %c8_i32_13 = arith.constant 8 : i32
    %40 = vector.broadcast %c8_i32_13 : i32 to vector<16x16xi32>
    %41 = arith.cmpi sge, %33, %40 : vector<16x16xi32>
    %c8_i32_14 = arith.constant 8 : i32
    %42 = vector.broadcast %c8_i32_14 : i32 to vector<16x16xi32>
    %43 = arith.cmpi slt, %34, %42 : vector<16x16xi32>
    %44 = arith.andi %41, %43 : vector<16x16xi1>
    %45 = arith.ori %39, %44 : vector<16x16xi1>
    %cst_15 = arith.constant 0xFF800000 : f32
    %46 = vector.broadcast %cst_15 : f32 to vector<16x16xf32>
    %47 = arith.select %45, %32, %46 : vector<16x16xi1>, vector<16x16xf32>
    %cst_16 = arith.constant dense<0xFF800000> : vector<16xf32>
    %48 = vector.multi_reduction <maximumf>, %47, %cst_16 [1] : vector<16x16xf32> to vector<16xf32>
    %49 = vector.shape_cast %48 : vector<16xf32> to vector<16x1xf32>
    %50 = vector.broadcast %49 : vector<16x1xf32> to vector<16x16xf32>
    %51 = arith.subf %47, %50 : vector<16x16xf32>
    %52 = math.exp %51 : vector<16x16xf32>
    %cst_17 = arith.constant dense<0.000000e+00> : vector<16xf32>
    %53 = vector.multi_reduction <add>, %52, %cst_17 [1] : vector<16x16xf32> to vector<16xf32>
    %54 = vector.shape_cast %53 : vector<16xf32> to vector<16x1xf32>
    %55 = math.log %54 : vector<16x1xf32>
    %56 = arith.addf %49, %55 : vector<16x1xf32>
    %57 = vector.extract_strided_slice %31 {offsets = [0, 0], sizes = [8, 32], strides = [1, 1]} : vector<16x32xf32> to vector<8x32xf32>
    %58 = vector.extract_strided_slice %29 {offsets = [8, 0], sizes = [8, 32], strides = [1, 1]} : vector<16x32xf32> to vector<8x32xf32>
    %59 = arith.mulf %57, %58 : vector<8x32xf32>
    %cst_18 = arith.constant dense<0.000000e+00> : vector<8xf32>
    %60 = vector.multi_reduction <add>, %59, %cst_18 [1] : vector<8x32xf32> to vector<8xf32>
    %61 = vector.shape_cast %60 : vector<8xf32> to vector<8x1xf32>
    %62 = tpu.concatenate %61, %61 in 0 : vector<8x1xf32>, vector<8x1xf32> -> vector<16x1xf32>
    %63 = arith.subf %56, %62 : vector<16x1xf32>
    %64 = vector.shape_cast %63 : vector<16x1xf32> to vector<1x16x1xf32>
    %cst_19 = arith.constant dense<0.000000e+00> : vector<1xf32>
    %65 = vector.multi_reduction <add>, %64, %cst_19 [1, 2] : vector<1x16x1xf32> to vector<1xf32>
    %66 = vector.shape_cast %65 : vector<1xf32> to vector<1x1x1xf32>
    %67 = vector.extract %66[0, 0, 0] : f32 from vector<1x1x1xf32>
    %cst_20 = arith.constant 1.600000e+01 : f32
    %68 = arith.divf %67, %cst_20 : f32
    %69 = arith.truncf %23 : vector<16x32xf32> to vector<16x32xbf16>
    %c0_21 = arith.constant 0 : index
    %c0_22 = arith.constant 0 : index
    %70 = vector.load %arg5[%c0_21, %c0_22] : memref<32x128xbf16, #tpu.memory_space<vmem>>, vector<32x128xbf16>
    %cst_23 = arith.constant dense<0.000000e+00> : vector<16x128xf32>
    %71 = tpu.matmul %69, %70, %cst_23 {dimension_numbers = #tpu.dot_dimension_numbers<[1], [0], [0], [1], [0, 0, 1, 1], [], []>} : vector<16x32xbf16>, vector<32x128xbf16>, vector<16x128xf32> -> vector<16x128xf32>
    %c0_24 = arith.constant 0 : index
    %c0_25 = arith.constant 0 : index
    %72 = vector.load %arg6[%c0_24, %c0_25] : memref<1x128xf32, #tpu.memory_space<vmem>>, vector<1x128xf32>
    %73 = vector.broadcast %72 : vector<1x128xf32> to vector<16x128xf32>
    %74 = arith.addf %71, %73 : vector<16x128xf32>
    %c0_26 = arith.constant 0 : index
    %c0_27 = arith.constant 0 : index
    %75 = vector.load %arg2[%c0_26, %c0_27] : memref<8x1xi32, #tpu.memory_space<vmem>>, vector<8x1xi32>
    %76 = tpu.concatenate %75, %75 in 0 : vector<8x1xi32>, vector<8x1xi32> -> vector<16x1xi32>
    %77 = tpu.iota {dimensions = array<i32: 1>} : vector<16x128xi32>
    %78 = vector.broadcast %76 : vector<16x1xi32> to vector<16x128xi32>
    %79 = arith.cmpi eq, %77, %78 : vector<16x128xi32>
    %80 = arith.extui %79 : vector<16x128xi1> to vector<16x128xi32>
    %81 = arith.sitofp %80 : vector<16x128xi32> to vector<16x128xf32>
    %cst_28 = arith.constant dense<0xFF800000> : vector<16xf32>
    %82 = vector.multi_reduction <maximumf>, %74, %cst_28 [1] : vector<16x128xf32> to vector<16xf32>
    %83 = vector.shape_cast %82 : vector<16xf32> to vector<16x1xf32>
    %84 = vector.broadcast %83 : vector<16x1xf32> to vector<16x128xf32>
    %85 = arith.subf %74, %84 : vector<16x128xf32>
    %86 = math.exp %85 : vector<16x128xf32>
    %cst_29 = arith.constant dense<0.000000e+00> : vector<16xf32>
    %87 = vector.multi_reduction <add>, %86, %cst_29 [1] : vector<16x128xf32> to vector<16xf32>
    %88 = vector.shape_cast %87 : vector<16xf32> to vector<16x1xf32>
    %89 = math.log %88 : vector<16x1xf32>
    %90 = arith.addf %83, %89 : vector<16x1xf32>
    %91 = arith.mulf %74, %81 : vector<16x128xf32>
    %cst_30 = arith.constant dense<0.000000e+00> : vector<16xf32>
    %92 = vector.multi_reduction <add>, %91, %cst_30 [1] : vector<16x128xf32> to vector<16xf32>
    %93 = vector.shape_cast %92 : vector<16xf32> to vector<16x1xf32>
    %94 = arith.subf %90, %93 : vector<16x1xf32>
    %95 = vector.shape_cast %94 : vector<16x1xf32> to vector<1x16x1xf32>
    %cst_31 = arith.constant dense<0.000000e+00> : vector<1xf32>
    %96 = vector.multi_reduction <add>, %95, %cst_31 [1, 2] : vector<1x16x1xf32> to vector<1xf32>
    %97 = vector.shape_cast %96 : vector<1xf32> to vector<1x1x1xf32>
    %98 = vector.extract %97[0, 0, 0] : f32 from vector<1x1x1xf32>
    %cst_32 = arith.constant 1.600000e+01 : f32
    %99 = arith.divf %98, %cst_32 : f32
    %cst_33 = arith.constant dense<0xFF800000> : vector<16xf32>
    %100 = vector.multi_reduction <maximumf>, %74, %cst_33 [1] : vector<16x128xf32> to vector<16xf32>
    %101 = vector.shape_cast %100 : vector<16xf32> to vector<16x1xf32>
    %102 = vector.broadcast %101 : vector<16x1xf32> to vector<16x128xf32>
    %103 = arith.cmpf oeq, %74, %102 : vector<16x128xf32>
    %c128_i32 = arith.constant 128 : i32
    %104 = vector.broadcast %c128_i32 : i32 to vector<16x128xi32>
    %105 = arith.select %103, %77, %104 : vector<16x128xi1>, vector<16x128xi32>
    %cst_34 = arith.constant dense<2147483647> : vector<16xi32>
    %106 = vector.multi_reduction <minsi>, %105, %cst_34 [1] : vector<16x128xi32> to vector<16xi32>
    %107 = vector.shape_cast %106 : vector<16xi32> to vector<16x1xi32>
    %108 = arith.cmpi eq, %107, %76 : vector<16x1xi32>
    %109 = arith.extui %108 : vector<16x1xi1> to vector<16x1xi32>
    %110 = arith.sitofp %109 : vector<16x1xi32> to vector<16x1xf32>
    %111 = vector.extract_strided_slice %110 {offsets = [0, 0], sizes = [8, 1], strides = [1, 1]} : vector<16x1xf32> to vector<8x1xf32>
    %112 = vector.shape_cast %111 : vector<8x1xf32> to vector<1x8x1xf32>
    %cst_35 = arith.constant dense<0.000000e+00> : vector<1xf32>
    %113 = vector.multi_reduction <add>, %112, %cst_35 [1, 2] : vector<1x8x1xf32> to vector<1xf32>
    %114 = vector.shape_cast %113 : vector<1xf32> to vector<1x1x1xf32>
    %115 = vector.extract %114[0, 0, 0] : f32 from vector<1x1x1xf32>
    %cst_36 = arith.constant 8.000000e+00 : f32
    %116 = arith.divf %115, %cst_36 : f32
    %117 = vector.extract_strided_slice %110 {offsets = [8, 0], sizes = [8, 1], strides = [1, 1]} : vector<16x1xf32> to vector<8x1xf32>
    %118 = vector.shape_cast %117 : vector<8x1xf32> to vector<1x8x1xf32>
    %cst_37 = arith.constant dense<0.000000e+00> : vector<1xf32>
    %119 = vector.multi_reduction <add>, %118, %cst_37 [1, 2] : vector<1x8x1xf32> to vector<1xf32>
    %120 = vector.shape_cast %119 : vector<1xf32> to vector<1x1x1xf32>
    %121 = vector.extract %120[0, 0, 0] : f32 from vector<1x1x1xf32>
    %cst_38 = arith.constant 8.000000e+00 : f32
    %122 = arith.divf %121, %cst_38 : f32
    %c0_39 = arith.constant 0 : index
    %c0_40 = arith.constant 0 : index
    %123 = memref.load %arg7[%c0_39, %c0_40] : memref<1x4xf32, #tpu.memory_space<smem>>
    memref.store %68, %arg7[%c0_39, %c0_40] : memref<1x4xf32, #tpu.memory_space<smem>>
    %c0_41 = arith.constant 0 : index
    %c1 = arith.constant 1 : index
    %124 = memref.load %arg7[%c0_41, %c1] : memref<1x4xf32, #tpu.memory_space<smem>>
    memref.store %99, %arg7[%c0_41, %c1] : memref<1x4xf32, #tpu.memory_space<smem>>
    %c0_42 = arith.constant 0 : index
    %c2 = arith.constant 2 : index
    %125 = memref.load %arg7[%c0_42, %c2] : memref<1x4xf32, #tpu.memory_space<smem>>
    memref.store %116, %arg7[%c0_42, %c2] : memref<1x4xf32, #tpu.memory_space<smem>>
    %c0_43 = arith.constant 0 : index
    %c3 = arith.constant 3 : index
    %126 = memref.load %arg7[%c0_43, %c3] : memref<1x4xf32, #tpu.memory_space<smem>>
    memref.store %122, %arg7[%c0_43, %c3] : memref<1x4xf32, #tpu.memory_space<smem>>
    return
  }
}

</mosaic_0001>

<bundles_post_ra>
// kernel: _tirrs_forward_fused.1
= control target key start
LH: loop header
LB: loop body
LE: loop exit
PB: predicated region body
PF: predicated region fallthrough
CT: control target
= control target key end

     0   :  { %13 = vsyncpa [#allocation4], 0  ;;  %s2572_s0 = inlined_call_operand.<no memory space> [shape: f32[1,1], index: 0, kind: input, shape index: {}]   ;;  %s2573_s1 = inlined_call_operand.vmem [shape: s32[8,16], index: 1, kind: input, shape index: {}]   ;;  %s2574_s2 = inlined_call_operand.vmem [shape: s32[8,1], index: 2, kind: input, shape index: {}]   ;;  %s2575_s3 = inlined_call_operand.vmem [shape: f32[8,32], index: 3, kind: input, shape index: {}]   ;;  %s2576_s4 = inlined_call_operand.hbm [shape: f32[128,32], index: 4, kind: input, shape index: {}]   ;;  %s2577_s5 = inlined_call_operand.vmem [shape: bf16[32,128], index: 5, kind: input, shape index: {}]   ;;  %s2578_s6 = inlined_call_operand.vmem [shape: f32[1,128], index: 6, kind: input, shape index: {}]   ;;  %s2579_s7 = inlined_call_operand.vmem [shape: f32[1,4], index: 7, kind: output, shape index: {}]  }
   0x1   :  { %14 = vsyncpa [#allocation5], 0  ;;  %s2017_s24 = smov [#allocation3]  }
   0x2   :  { %s28_s25 = sshll.u32 %s2017_s24, 4  ;;  %s29_s25 = int_to_ptr.vmem [resolvable:$true] %s28_s25 }
   0x3   :  { %s1989_s26 = scalar_lea.vmem %s29_s25, 2048  ;;  %p1994_p1 = scmp.lt.s32.totalorder %s29_s25, %s29_s25 }
   0x4   :  { %p1990_p0 = scmp.ne.s32.totalorder %s29_s25, %s1989_s26  ;;  %p1995_p2 = scmp.lt.s32.totalorder %s1989_s26, %s1989_s26 }
   0x6   :  { %p1996_p3 = por %p1995_p2, %p1994_p1 }
   0x8   :  { %p1997_p4 = pnand %p1996_p3, %p1990_p0 }
   0xa   :  { %2000 = shalt.err (!%p1997_p4)
}
   0xb   :  { %s2018_s27 = smov 128   ;;  %s2019_s28 = smov 8  }
   0xc   :  { %34 = dma.hbm_to_vmem [thread:$0]  %s2576_s4, 2048, %s29_s25, [#allocation4], %s2018_s27, %s2018_s27, %s2019_s28  }
   0xd   :  { %2013 = dma.done.wait [#allocation4], 2048  }
   0xe   :  { %2014 = vsyncadd [#allocation4], 4294965248  ;;  %vm47_vm0 = vcmask 130048   ;;  %v44_v0 = vld [vmem:[%s2573_s1] sm:$0xff]  ;;  %v45_v9 = vlaneseq  ;;  %v95_v19 = vld [vmem:[#allocation3 + $0x78] sm:$0xff]  ;;  %v2020_v22 = vmov 0.0  }
   0xf   :  { %v48_v1 = vsel %vm47_vm0, %v44_v0, 2147483648  ;;  %v94_v20 = vld [vmem:[#allocation3 + $0x70] sm:$0xff]  ;;  %v93_v21 = vld [vmem:[#allocation3 + $0x68] sm:$0xff]  ;;  %1717 = vmatprep.subr.mxu1 %v2020_v22  ;;  %v2084_v23 = vand.u32 4294901760, %v95_v19  ;;  %v92_v26 = vld [vmem:[#allocation3 + $0x60] sm:$0xff]  ;;  %1682 = vmatprep.subr.mxu0 %v2020_v22  ;;  %vm2021_vm4 = vmmov 0  }
  0x10   :  { %v50_v2 = vshra.s32 %v48_v1, 16  ;;  %v49_v4 = vand.u32 65535, %v48_v1  ;;  %v2073_v13 = vand.u32 127, %v45_v9  ;;  %v2086_v24 = vand.u32 4294901760, %v94_v20  ;;  %v91_v27 = vld [vmem:[#allocation3 + $0x58] sm:$0xff]  ;;  %v90_v28 = vld [vmem:[#allocation3 + $0x50] sm:$0xff]  ;;  %1749 = vmatprep.mubr.msk.f32.mxu1 %vm2021_vm4, %v2020_v22  ;;  %1714 = vmatprep.mubr.msk.f32.mxu0 %vm2021_vm4, %v2020_v22 }
  0x11   :  { %v2088_v25 = vand.u32 4294901760, %v93_v21  ;;  %v2091_v29 = vand.u32 4294901760, %v92_v26  ;;  %v2093_v30 = vand.u32 4294901760, %v91_v27  ;;  %v2095_v31 = vand.u32 4294901760, %v90_v28  ;;  %v89_v32 = vld [vmem:[#allocation3 + $0x48] sm:$0xff]  ;;  %v88_v33 = vld [vmem:[#allocation3 + $0x40] sm:$0xff]  ;;  %1683 = vmatpush3.msra.mxu0 %v2084_v23 }
  0x12   :  { %v52_v3 = vcvt.s32.f32 %v50_v2  ;;  %v51_v5 = vcvt.s32.f32 %v49_v4  ;;  %v2098_v34 = vsub.f32 %v95_v19, %v2084_v23  ;;  %v2101_v35 = vsub.f32 %v94_v20, %v2086_v24  ;;  %1684 = vmatprep.subr.mxu0 %v2020_v22  ;;  %v87_v53 = vld [vmem:[#allocation3 + $0x38] sm:$0xff]  ;;  %v86_v54 = vld [vmem:[#allocation3 + $0x30] sm:$0xff]  ;;  %v85_v55 = vld [vmem:[#allocation3 + $0x28] sm:$0xff]  ;;  %s1532_s17 = sshll.u32 %s2579_s7, 4  ;;  %s1533_s17 = int_to_ptr.vmem [resolvable:$true] %s1532_s17 }
  0x13   :  { %v2104_v36 = vsub.f32 %v93_v21, %v2088_v25  ;;  %v2107_v37 = vand.u32 4294901760, %v89_v32  ;;  %v2110_v38 = vsub.f32 %v92_v26, %v2091_v29  ;;  %v2113_v39 = vsub.f32 %v91_v27, %v2093_v30  ;;  %1685 = vmatpush3.msra.mxu0 %v2086_v24  ;;  %v84_v61 = vld [vmem:[#allocation3 + $0x20] sm:$0xff]  ;;  %v83_v4 = vld [vmem:[#allocation3 + $0x18] sm:$0xff]  ;;  %s2001_s26 = scalar_lea.vmem %s1533_s17, 16  ;;  %p2006_p6 = scmp.lt.s32.totalorder %s1533_s17, %s1533_s17 }
  0x14   :  { %53 = vmax.xlane.f32.xlu0 %v52_v3  ;;  %v2117_v40 = vsub.f32 %v90_v28, %v2095_v31  ;;  %v2119_v41 = vand.u32 4294901760, %v88_v33  ;;  %v197_v42 = vand.u32 4294901760, %v2098_v34  ;;  %v204_v43 = vand.u32 4294901760, %v2101_v35  ;;  %1686 = vmatprep.subr.mxu0 %v2020_v22  ;;  %p2002_p5 = scmp.ne.s32.totalorder %s1533_s17, %s2001_s26  ;;  %p2007_p7 = scmp.lt.s32.totalorder %s2001_s26, %s2001_s26 }
  0x15   :  { %v211_v44 = vand.u32 4294901760, %v2104_v36  ;;  %v218_v45 = vand.u32 4294901760, %v2110_v38  ;;  %v225_v46 = vand.u32 4294901760, %v2113_v39  ;;  %v2129_v47 = vsub.f32 %v89_v32, %v2107_v37  ;;  %1687 = vmatpush3.msra.mxu0 %v2088_v25 }
  0x16   :  { %v198_v48 = vsub.f32 %v2098_v34, %v197_v42  ;;  %v205_v49 = vsub.f32 %v2101_v35, %v204_v43  ;;  %v232_v51 = vand.u32 4294901760, %v2117_v40  ;;  %1688 = vmatprep.subr.mxu0 %v2020_v22  ;;  %v2144_v52 = vsub.f32 %v88_v33, %v2119_v41  ;;  %p2008_p8 = por %p2007_p7, %p2006_p6 }
  0x17   :  { %v212_v50 = vsub.f32 %v2104_v36, %v211_v44  ;;  %v219_v58 = vsub.f32 %v2110_v38, %v218_v45  ;;  %1689 = vmatpush3.msra.mxu0 %v2091_v29  ;;  %v226_v59 = vsub.f32 %v2113_v39, %v225_v46  ;;  %v239_v60 = vand.u32 4294901760, %v2129_v47 }
  0x18   :  { %v199_v56 = vand.u32 4294901760, %v198_v48  ;;  %v206_v57 = vand.u32 4294901760, %v205_v49  ;;  %1690 = vmatprep.subr.mxu0 %v2020_v22  ;;  %v2155_v63 = vand.u32 4294901760, %v87_v53  ;;  %v2160_v1 = vand.u32 4294901760, %v85_v55  ;;  %p2009_p9 = pnand %p2008_p8, %p2002_p5 }
  0x19   :  { %v213_v62 = vand.u32 4294901760, %v212_v50  ;;  %1691 = vmatpush3.msra.mxu0 %v2093_v30  ;;  %v233_v2 = vsub.f32 %v2117_v40, %v232_v51  ;;  %vm747_vm6 = vcmask 261120   ;;  %vm1283_vm7 = vcmp.lt.s32.totalorder %v2073_v13, 8 }
  0x1a   :  { %1718 = vmatpush3.msra.mxu1 %v199_v56  ;;  %1692 = vmatprep.subr.mxu0 %v2020_v22  ;;  %vm1278_vm8 = vcmp.ge.s32.totalorder %v2073_v13, 8  ;;  %vm1320_vm15 = vcmask 7168  }
  0x1b   :  { %1719 = vmatprep.subr.mxu1 %v2020_v22  ;;  %1693 = vmatpush3.msra.mxu0 %v2095_v31 }
  0x1c   :  { %1720 = vmatpush3.msra.mxu1 %v206_v57  ;;  %1694 = vmatprep.subr.mxu0 %v2020_v22 }
  0x1d   :  { %1721 = vmatprep.subr.mxu1 %v2020_v22  ;;  %1695 = vmatpush3.msra.mxu0 %v2107_v37 }
  0x1e   :  { %1722 = vmatpush3.msra.mxu1 %v213_v62  ;;  %1696 = vmatprep.subr.mxu0 %v2020_v22 }
  0x1f   :  { %1723 = vmatprep.subr.mxu1 %v2020_v22  ;;  %1697 = vmatpush3.msra.mxu0 %v2119_v41 }
  0x20   :  { %1698 = vmatprep.subr.mxu0 %v2020_v22 }
  0x21   :  { %1699 = vmatpush3.msra.mxu0 %v2155_v63 }
  0x22   :  { %1700 = vmatprep.subr.mxu0 %v2020_v22 }
  0x9d   :  { %v54_v6 = vpop.xlane.xlu0 %53 }
  0x9e   :  { %vm55_vm1 = vcmp.eq.f32.partialorder %v52_v3, %v54_v6  ;;  %v60_v8 = vcvt.f32.s32 %v54_v6  ;;  %v246_v3 = vand.u32 4294901760, %v2144_v52  ;;  %v2169_v6 = vsub.f32 %v87_v53, %v2155_v63 }
  0x9f   :  { %v56_v7 = vsel %vm55_vm1, %v51_v5, -inf  ;;  %v220_v5 = vand.u32 4294901760, %v219_v58 }
  0xa0   :  { %57 = vmax.xlane.f32.xlu0 %v56_v7  ;;  %v61_v11 = vshll.u32 %v60_v8, 16  ;;  %v2175_v8 = vand.u32 4294901760, %v84_v61  ;;  %v247_v19 = vsub.f32 %v2144_v52, %v246_v3 }
  0xa1   :  { %1724 = vmatpush3.msra.mxu1 %v220_v5 }
  0xa2   :  { %v2196_v21 = vsub.f32 %v84_v61, %v2175_v8  ;;  %1725 = vmatprep.subr.mxu1 %v2020_v22  ;;  %v248_v33 = vand.u32 4294901760, %v247_v19 }
  0xa4   :  { %v274_v49 = vand.u32 4294901760, %v2196_v21 }
  0xa6   :  { %v275_v56 = vsub.f32 %v2196_v21, %v274_v49 }
 0x129   :  { %v58_v10 = vpop.xlane.xlu0 %57 }
 0x12a   :  { %v59_v12 = vcvt.f32.s32 %v58_v10  ;;  %v240_v10 = vsub.f32 %v2129_v47, %v239_v60 }
 0x12c   :  { %v62_v14 = vadd.s32 %v61_v11, %v59_v12  ;;  %v227_v11 = vand.u32 4294901760, %v226_v59  ;;  %v253_v12 = vand.u32 4294901760, %v2169_v6  ;;  %v241_v26 = vand.u32 4294901760, %v240_v10  ;;  %v82_v10 = vld [vmem:[#allocation3 + $0x10] sm:$0xff] }
 0x12d   :  { %v276_v59 = vand.u32 4294901760, %v275_v56 }
 0x12e   :  { %vm63_vm2 = vcmp.eq.s32.totalorder %v44_v0, %v62_v14  ;;  %v2158_v0 = vand.u32 4294901760, %v86_v54  ;;  %v2184_v14 = vsub.f32 %v85_v55, %v2160_v1  ;;  %1726 = vmatpush3.msra.mxu1 %v227_v11  ;;  %v254_v27 = vsub.f32 %v2169_v6, %v253_v12 }
 0x12f   :  { %v64_v15 = vsel %vm63_vm2, %v2073_v13, 16  ;;  %1727 = vmatprep.subr.mxu1 %v2020_v22  ;;  %v2243_v11 = vand.u32 4294901760, %v82_v10 }
 0x130   :  { %v2077_v16 = vsel %vm47_vm0, %v64_v15, 2147483647  ;;  %v2172_v7 = vsub.f32 %v86_v54, %v2158_v0  ;;  %v2187_v15 = vand.u32 4294901760, %v83_v4  ;;  %v267_v28 = vand.u32 4294901760, %v2184_v14  ;;  %1701 = vmatpush3.msra.mxu0 %v2158_v0 }
 0x131   :  { %v67_v17 = vshra.s32 %v2077_v16, 16  ;;  %1702 = vmatprep.subr.mxu0 %v2020_v22  ;;  %v255_v50 = vand.u32 4294901760, %v254_v27  ;;  %v66_v62 = vand.u32 65535, %v2077_v16  ;;  %v2246_v19 = vsub.f32 %v82_v10, %v2243_v11  ;;  %v80_v27 = vld [vmem:[#allocation3] sm:$0xff] }
 0x132   :  { %v260_v20 = vand.u32 4294901760, %v2172_v7  ;;  %v2206_v32 = vsub.f32 %v83_v4, %v2187_v15  ;;  %v268_v53 = vsub.f32 %v2184_v14, %v267_v28  ;;  %1703 = vmatpush3.msra.mxu0 %v2160_v1 }
 0x133   :  { %v2080_v18 = vcvt.s32.f32 %v67_v17  ;;  %v234_v17 = vand.u32 4294901760, %v233_v2  ;;  %1704 = vmatprep.subr.mxu0 %v2020_v22  ;;  %v68_v4 = vcvt.s32.f32 %v66_v62  ;;  %v288_v16 = vand.u32 4294901760, %v2246_v19 }
 0x134   :  { %v261_v48 = vsub.f32 %v2172_v7, %v260_v20  ;;  %v281_v54 = vand.u32 4294901760, %v2206_v32  ;;  %1705 = vmatpush3.msra.mxu0 %v2175_v8  ;;  %v269_v57 = vand.u32 4294901760, %v268_v53 }
 0x135   :  { %70 = vmin.xlane.f32.xlu1 %v2080_v18  ;;  %1728 = vmatpush3.msra.mxu1 %v234_v17  ;;  %v81_v17 = vld [vmem:[#allocation3 + $0x8] sm:$0xff] }
 0x136   :  { %1729 = vmatprep.subr.mxu1 %v2020_v22  ;;  %v262_v55 = vand.u32 4294901760, %v261_v48  ;;  %1706 = vmatprep.subr.mxu0 %v2020_v22  ;;  %v282_v58 = vsub.f32 %v2206_v32, %v281_v54  ;;  %v289_v48 = vsub.f32 %v2246_v19, %v288_v16 }
 0x137   :  { %1730 = vmatpush3.msra.mxu1 %v241_v26  ;;  %1707 = vmatpush3.msra.mxu0 %v2187_v15  ;;  %v2248_v26 = vand.u32 4294901760, %v81_v17 }
 0x138   :  { %1731 = vmatprep.subr.mxu1 %v2020_v22  ;;  %1708 = vmatprep.subr.mxu0 %v2020_v22  ;;  %v283_v61 = vand.u32 4294901760, %v282_v58 }
 0x139   :  { %1732 = vmatpush3.msra.mxu1 %v248_v33  ;;  %1709 = vmatpush3.msra.mxu0 %v2243_v11  ;;  %v2256_v33 = vand.u32 4294901760, %v80_v27 }
 0x13a   :  { %1733 = vmatprep.subr.mxu1 %v2020_v22  ;;  %1710 = vmatprep.subr.mxu0 %v2020_v22 }
 0x13b   :  { %1734 = vmatpush3.msra.mxu1 %v255_v50  ;;  %1711 = vmatpush3.msra.mxu0 %v2248_v26  ;;  %v2265_v53 = vsub.f32 %v80_v27, %v2256_v33 }
 0x13c   :  { %1735 = vmatprep.subr.mxu1 %v2020_v22  ;;  %1712 = vmatprep.subr.mxu0 %v2020_v22 }
 0x13d   :  { %1736 = vmatpush3.msra.mxu1 %v262_v55  ;;  %1713 = vmatpush3.msra.mxu0 %v2256_v33  ;;  %v290_v55 = vand.u32 4294901760, %v289_v48 }
 0x13e   :  { %1737 = vmatprep.subr.mxu1 %v2020_v22  ;;  %1752 = vmatprep.subr.mxu0 %v2020_v22 }
 0x13f   :  { %1738 = vmatpush3.msra.mxu1 %v269_v57  ;;  %v302_v57 = vand.u32 4294901760, %v2265_v53 }
 0x140   :  { %1739 = vmatprep.subr.mxu1 %v2020_v22 }
 0x141   :  { %1740 = vmatpush3.msra.mxu1 %v276_v59  ;;  %v303_v59 = vsub.f32 %v2265_v53, %v302_v57 }
 0x142   :  { %1741 = vmatprep.subr.mxu1 %v2020_v22 }
 0x143   :  { %1742 = vmatpush3.msra.mxu1 %v283_v61  ;;  %v304_v61 = vand.u32 4294901760, %v303_v59 }
 0x144   :  { %1743 = vmatprep.subr.mxu1 %v2020_v22 }
 0x145   :  { %1744 = vmatpush3.msra.mxu1 %v290_v55 }
 0x146   :  { %1745 = vmatprep.subr.mxu1 %v2020_v22 }
 0x1be   :  { %v71_v2 = vpop.xlane.xlu1 %70 }
 0x1bf   :  { %vm72_vm3 = vcmp.eq.f32.partialorder %v2080_v18, %v71_v2  ;;  %v2254_v18 = vsub.f32 %v81_v17, %v2248_v26  ;;  %v77_v62 = vcvt.f32.s32 %v71_v2 }
 0x1c0   :  { %v73_v5 = vsel %vm72_vm3, %v68_v4, inf  ;;  %v97_v4 = vshrl.u32 %v45_v9, 7 }
 0x1c1   :  { %74 = vmin.xlane.f32.xlu1 %v73_v5  ;;  %v295_v50 = vand.u32 4294901760, %v2254_v18  ;;  %v78_v10 = vshll.u32 %v77_v62, 16 }
 0x1c2   :  { %v98_v17 = vmul.u32 16, %v97_v4 }
 0x1c3   :  { %v296_v56 = vsub.f32 %v2254_v18, %v295_v50 }
 0x1c5   :  { %v297_v58 = vand.u32 4294901760, %v296_v56 }
 0x1c7   :  { %1746 = vmatpush3.msra.mxu1 %v297_v58  ;;  %v2022_v58 = vmov 1.0  }
 0x1c8   :  { %1747 = vmatprep.subr.mxu1 %v2020_v22 }
 0x1c9   :  { %1748 = vmatpush3.msra.mxu1 %v304_v61 }
 0x1ca   :  { %1787 = vmatprep.subr.mxu1 %v2020_v22 }
 0x24a   :  { %v75_v5 = vpop.xlane.xlu1 %74 }
 0x24b   :  { %v76_v27 = vcvt.f32.s32 %v75_v5 }
 0x24d   :  { %v79_v48 = vadd.s32 %v78_v10, %v76_v27 }
 0x24f   :  { %v2284_v55 = vadd.s32 %v98_v17, %v79_v48 }
 0x251   :  { %vm100_vm5 = vcmp.eq.s32.totalorder %v2073_v13, %v2284_v55  ;;  %v1959_v55 = vld [vmem:[%s2577_s5 + $0x8] sm:$0xff]  }
 0x252   :  { %v1542_v56 = vsel %vm100_vm5, 1.0, %v2020_v22  ;;  %1750 = vmatmul.mubr.msk.f32.vlgmr.msra.gmra.mxu1 %vm100_vm5, %v2022_v58 }
 0x253   :  { %v2296_v9 = vsub.f32 %v1542_v56, %v1542_v56  ;;  %1788 = vmatpush3.msra.mxu1 %v2084_v23  ;;  %1819 = vmatprep.mubr.msk.f32.mxu1 %vm2021_vm4, %v2020_v22  ;;  %v1960_v56 = vld [vmem:[%s2577_s5] sm:$0xff]  }
 0x254   :  { %1789 = vmatprep.subr.mxu1 %v2020_v22 }
 0x255   :  { %1790 = vmatpush3.msra.mxu1 %v2086_v24  ;;  %v186_v2 = vand.u32 4294901760, %v2296_v9 }
 0x256   :  { %1791 = vmatprep.subr.mxu1 %v2020_v22 }
 0x257   :  { %1792 = vmatpush3.msra.mxu1 %v2088_v25  ;;  %v187_v59 = vsub.f32 %v2296_v9, %v186_v2 }
 0x258   :  { %1793 = vmatprep.subr.mxu1 %v2020_v22 }
 0x259   :  { %1794 = vmatpush3.msra.mxu1 %v2091_v29  ;;  %v188_v61 = vand.u32 4294901760, %v187_v59 }
 0x25a   :  { %1795 = vmatprep.subr.mxu1 %v2020_v22 }
 0x25b   :  { %1796 = vmatpush3.msra.mxu1 %v2093_v30  ;;  %1715 = vmatmul.mubr.f32.vlgmr.msra.gmra.mxu0 %v188_v61 }
 0x25c   :  { %1753 = vmatpush3.msra.mxu0 %v2098_v34  ;;  %1797 = vmatprep.subr.mxu1 %v2020_v22 }
 0x25d   :  { %1754 = vmatprep.subr.mxu0 %v2020_v22  ;;  %1798 = vmatpush3.msra.mxu1 %v2095_v31 }
 0x25e   :  { %1755 = vmatpush3.msra.mxu0 %v2101_v35  ;;  %1799 = vmatprep.subr.mxu1 %v2020_v22 }
 0x25f   :  { %1756 = vmatprep.subr.mxu0 %v2020_v22  ;;  %1800 = vmatpush3.msra.mxu1 %v2107_v37 }
 0x260   :  { %1757 = vmatpush3.msra.mxu0 %v2104_v36  ;;  %1801 = vmatprep.subr.mxu1 %v2020_v22 }
 0x261   :  { %1758 = vmatprep.subr.mxu0 %v2020_v22  ;;  %1802 = vmatpush3.msra.mxu1 %v2119_v41 }
 0x262   :  { %1759 = vmatpush3.msra.mxu0 %v2110_v38  ;;  %1803 = vmatprep.subr.mxu1 %v2020_v22 }
 0x263   :  { %1760 = vmatprep.subr.mxu0 %v2020_v22  ;;  %1804 = vmatpush3.msra.mxu1 %v2155_v63 }
 0x264   :  { %1761 = vmatpush3.msra.mxu0 %v2113_v39  ;;  %1805 = vmatprep.subr.mxu1 %v2020_v22 }
 0x265   :  { %1762 = vmatprep.subr.mxu0 %v2020_v22  ;;  %1806 = vmatpush3.msra.mxu1 %v2158_v0 }
 0x266   :  { %1763 = vmatpush3.msra.mxu0 %v2117_v40  ;;  %1807 = vmatprep.subr.mxu1 %v2020_v22 }
 0x267   :  { %1764 = vmatprep.subr.mxu0 %v2020_v22  ;;  %1808 = vmatpush3.msra.mxu1 %v2160_v1 }
 0x268   :  { %1765 = vmatpush3.msra.mxu0 %v2129_v47  ;;  %1809 = vmatprep.subr.mxu1 %v2020_v22 }
 0x269   :  { %1766 = vmatprep.subr.mxu0 %v2020_v22  ;;  %1810 = vmatpush3.msra.mxu1 %v2175_v8 }
 0x26a   :  { %1767 = vmatpush3.msra.mxu0 %v2144_v52  ;;  %1811 = vmatprep.subr.mxu1 %v2020_v22 }
 0x26b   :  { %1768 = vmatprep.subr.mxu0 %v2020_v22  ;;  %1812 = vmatpush3.msra.mxu1 %v2187_v15 }
 0x26c   :  { %1769 = vmatpush3.msra.mxu0 %v2169_v6  ;;  %1813 = vmatprep.subr.mxu1 %v2020_v22 }
 0x26d   :  { %1770 = vmatprep.subr.mxu0 %v2020_v22  ;;  %1814 = vmatpush3.msra.mxu1 %v2243_v11 }
 0x26e   :  { %1771 = vmatpush3.msra.mxu0 %v2172_v7  ;;  %1815 = vmatprep.subr.mxu1 %v2020_v22 }
 0x26f   :  { %1772 = vmatprep.subr.mxu0 %v2020_v22  ;;  %1816 = vmatpush3.msra.mxu1 %v2248_v26 }
 0x270   :  { %1773 = vmatpush3.msra.mxu0 %v2184_v14  ;;  %1817 = vmatprep.subr.mxu1 %v2020_v22 }
 0x271   :  { %1774 = vmatprep.subr.mxu0 %v2020_v22  ;;  %1818 = vmatpush3.msra.mxu1 %v2256_v33 }
 0x272   :  { %1775 = vmatpush3.msra.mxu0 %v2196_v21  ;;  %1820 = vmatmul.mubr.f32.vlgmr.msra.gmra.mxu1 %v186_v2 }
 0x273   :  { %1857 = vmatprep.subr.mxu1 %v2020_v22  ;;  %1776 = vmatprep.subr.mxu0 %v2020_v22 }
 0x274   :  { %1858 = vmatpush3.msra.mxu1 %v2084_v23  ;;  %1777 = vmatpush3.msra.mxu0 %v2206_v32  ;;  %v2462_v23 = vld [vmem:[%s2575_s3] sm:$0xff] }
 0x275   :  { %1859 = vmatprep.subr.mxu1 %v2020_v22  ;;  %1778 = vmatprep.subr.mxu0 %v2020_v22 }
 0x276   :  { %1860 = vmatpush3.msra.mxu1 %v2086_v24  ;;  %1779 = vmatpush3.msra.mxu0 %v2246_v19  ;;  %v745_v24 = vmul.f32 %v2462_v23, %v2462_v23 }
 0x277   :  { %1861 = vmatprep.subr.mxu1 %v2020_v22  ;;  %1780 = vmatprep.subr.mxu0 %v2020_v22 }
 0x278   :  { %1862 = vmatpush3.msra.mxu1 %v2088_v25  ;;  %1781 = vmatpush3.msra.mxu0 %v2254_v18  ;;  %v748_v25 = vsel %vm747_vm6, %v745_v24, 0.0 }
 0x279   :  { %1863 = vmatprep.subr.mxu1 %v2020_v22  ;;  %1782 = vmatprep.subr.mxu0 %v2020_v22 }
 0x27a   :  { %1864 = vmatpush3.msra.mxu1 %v2091_v29  ;;  %1783 = vmatpush3.msra.mxu0 %v2265_v53 }
 0x27b   :  { %1784 = vmatprep.mubr.msk.f32.mxu0 %vm2021_vm4, %v2020_v22  ;;  %1865 = vmatprep.subr.mxu1 %v2020_v22 }
 0x27c   :  { %1785 = vmatmul.mubr.f32.vlgmr.msra.gmra.mxu0 %v2296_v9  ;;  %1822 = vmatprep.subr.mxu0 %v2020_v22 }
 0x27d   :  { %1866 = vmatpush3.msra.mxu1 %v2093_v30  ;;  %1823 = vmatpush3.msra.mxu0 %v197_v42 }
 0x27e   :  { %1867 = vmatprep.subr.mxu1 %v2020_v22  ;;  %1824 = vmatprep.subr.mxu0 %v2020_v22 }
 0x27f   :  { %1868 = vmatpush3.msra.mxu1 %v2095_v31  ;;  %1825 = vmatpush3.msra.mxu0 %v204_v43 }
 0x280   :  { %1869 = vmatprep.subr.mxu1 %v2020_v22  ;;  %1826 = vmatprep.subr.mxu0 %v2020_v22 }
 0x281   :  { %1870 = vmatpush3.msra.mxu1 %v2107_v37  ;;  %1827 = vmatpush3.msra.mxu0 %v211_v44 }
 0x282   :  { %1871 = vmatprep.subr.mxu1 %v2020_v22  ;;  %1828 = vmatprep.subr.mxu0 %v2020_v22 }
 0x283   :  { %1872 = vmatpush3.msra.mxu1 %v2119_v41  ;;  %1829 = vmatpush3.msra.mxu0 %v218_v45 }
 0x284   :  { %1873 = vmatprep.subr.mxu1 %v2020_v22  ;;  %1830 = vmatprep.subr.mxu0 %v2020_v22 }
 0x285   :  { %1874 = vmatpush3.msra.mxu1 %v2155_v63  ;;  %1831 = vmatpush3.msra.mxu0 %v225_v46 }
 0x286   :  { %1875 = vmatprep.subr.mxu1 %v2020_v22  ;;  %1832 = vmatprep.subr.mxu0 %v2020_v22 }
 0x287   :  { %1876 = vmatpush3.msra.mxu1 %v2158_v0  ;;  %1833 = vmatpush3.msra.mxu0 %v232_v51 }
 0x288   :  { %1877 = vmatprep.subr.mxu1 %v2020_v22  ;;  %1834 = vmatprep.subr.mxu0 %v2020_v22 }
 0x289   :  { %1878 = vmatpush3.msra.mxu1 %v2160_v1  ;;  %1835 = vmatpush3.msra.mxu0 %v239_v60  ;;  %v758_v1 = vstv %s2572_s0 }
 0x28a   :  { %1879 = vmatprep.subr.mxu1 %v2020_v22  ;;  %1836 = vmatprep.subr.mxu0 %v2020_v22 }
 0x28b   :  { %1880 = vmatpush3.msra.mxu1 %v2175_v8  ;;  %1837 = vmatpush3.msra.mxu0 %v246_v3 }
 0x28c   :  { %1881 = vmatprep.subr.mxu1 %v2020_v22  ;;  %1838 = vmatprep.subr.mxu0 %v2020_v22 }
 0x28d   :  { %1882 = vmatpush3.msra.mxu1 %v2187_v15  ;;  %1839 = vmatpush3.msra.mxu0 %v253_v12 }
 0x28e   :  { %1883 = vmatprep.subr.mxu1 %v2020_v22  ;;  %1840 = vmatprep.subr.mxu0 %v2020_v22 }
 0x28f   :  { %1884 = vmatpush3.msra.mxu1 %v2243_v11  ;;  %1841 = vmatpush3.msra.mxu0 %v260_v20 }
 0x290   :  { %1885 = vmatprep.subr.mxu1 %v2020_v22  ;;  %1842 = vmatprep.subr.mxu0 %v2020_v22 }
 0x291   :  { %1886 = vmatpush3.msra.mxu1 %v2248_v26  ;;  %1843 = vmatpush3.msra.mxu0 %v267_v28 }
 0x292   :  { %1887 = vmatprep.subr.mxu1 %v2020_v22  ;;  %1844 = vmatprep.subr.mxu0 %v2020_v22 }
 0x293   :  { %1888 = vmatpush3.msra.mxu1 %v2256_v33  ;;  %1889 = vmatprep.mubr.msk.f32.mxu1 %vm2021_vm4, %v2020_v22 }
 0x294   :  { %1845 = vmatpush3.msra.mxu0 %v274_v49  ;;  %1890 = vmatmul.mubr.msk.f32.vlgmr.msra.gmra.mxu1 %vm100_vm5, %v2022_v58 }
 0x295   :  { %1846 = vmatprep.subr.mxu0 %v2020_v22  ;;  %1854 = vmatprep.mubr.msk.f32.mxu0 %vm2021_vm4, %v2020_v22 }
 0x296   :  { %1847 = vmatpush3.msra.mxu0 %v281_v54  ;;  %749 = vadd.xlane.f32.xlu1 %v748_v25 }
 0x297   :  { %1848 = vmatprep.subr.mxu0 %v2020_v22 }
 0x298   :  { %1849 = vmatpush3.msra.mxu0 %v288_v16 }
 0x299   :  { %1850 = vmatprep.subr.mxu0 %v2020_v22 }
 0x29a   :  { %1851 = vmatpush3.msra.mxu0 %v295_v50 }
 0x29b   :  { %1852 = vmatprep.subr.mxu0 %v2020_v22 }
 0x29c   :  { %1853 = vmatpush3.msra.mxu0 %v302_v57 }
 0x29d   :  { %1855 = vmatmul.mubr.msk.f32.vlgmr.msra.gmra.mxu0 %vm100_vm5, %v2022_v58 }
 0x312   :  { %v341_v29 = vpop.f32.mrf.mxu1 }
 0x314   :  { %v1751_v30 = vpop.f32.mrf.mxu1 }
 0x31b   :  { %v190_v31 = vpop.f32.mrf.mxu0 }
 0x31c   :  { %v342_v40 = vadd.f32 %v341_v29, %v190_v31 }
 0x31d   :  { %v1716_v34 = vpop.f32.mrf.mxu0 }
 0x31f   :  { %v750_v60 = vpop.xlane.xlu1 %749 }
 0x320   :  { %1961 = vrsqrt.f32 %v750_v60 }
 0x32d   :  { %v1962_v63 = vpop.eup %1961 }
 0x32e   :  { %v756_v0 = vmul.f32 %v1962_v63, %v2462_v23 }
 0x330   :  { %v2476_v3 = vmul.f32 %v758_v1, %v756_v0  ;;  %v768_v21 = vsel %vm747_vm6, %v756_v0, 0 }
 0x331   :  { %v805_v32 = vand.u32 4294901760, %v768_v21 }
 0x332   :  { %v534_v35 = vpop.f32.mrf.mxu1  ;;  %v762_v6 = vsel %vm747_vm6, %v2476_v3, 0 }
 0x333   :  { %v2480_v7 = vand.u32 4294901760, %v762_v6  ;;  %v897_v26 = vsub.f32 %v768_v21, %v805_v32 }
 0x334   :  { %v1821_v36 = vpop.f32.mrf.mxu1 }
 0x335   :  { %v841_v8 = vsub.f32 %v762_v6, %v2480_v7  ;;  %v898_v57 = vand.u32 4294901760, %v897_v26 }
 0x337   :  { %1910 = vmatprep.mubr.f32.mxu0 %v841_v8  ;;  %v842_v12 = vand.u32 4294901760, %v841_v8  ;;  %v899_v17 = vsub.f32 %v897_v26, %v898_v57 }
 0x339   :  { %v843_v14 = vsub.f32 %v841_v8, %v842_v12  ;;  %v900_v48 = vand.u32 4294901760, %v899_v17 }
 0x33b   :  { %v844_v15 = vand.u32 4294901760, %v843_v14 }
 0x33c   :  { %v445_v37 = vpop.f32.mrf.mxu0 }
 0x33d   :  { %v446_v42 = vadd.f32 %v445_v37, %v342_v40  ;;  %1896 = vmatprep.mubr.f32.mxu1 %v844_v15 }
 0x33e   :  { %v1786_v38 = vpop.f32.mrf.mxu0 }
 0x33f   :  { %v535_v43 = vadd.f32 %v534_v35, %v446_v42  ;;  %v1546_v35 = vld [vmem:[%s2578_s6] ss:$0 sm:$0xff] }
 0x354   :  { %v740_v39 = vpop.f32.mrf.mxu1 }
 0x356   :  { %v1891_v41 = vpop.f32.mrf.mxu1 }
 0x35d   :  { %v653_v44 = vpop.f32.mrf.mxu0 }
 0x35e   :  { %v654_v45 = vadd.f32 %v653_v44, %v535_v43 }
 0x35f   :  { %v1856_v46 = vpop.f32.mrf.mxu0 }
 0x360   :  { %v2467_v47 = vadd.f32 %v740_v39, %v654_v45 }
 0x362   :  { %v746_v51 = vmul.f32 %v2467_v47, %v2467_v47  ;;  %v1336_v58 = vpack.c.bf16 %v2467_v47, %v2462_v23 }
 0x364   :  { %v751_v52 = vsel %vm747_vm6, %v746_v51, 0.0 }
 0x365   :  { %752 = vadd.xlane.f32.xlu0 %v751_v52 }
 0x3ee   :  { %v753_v20 = vpop.xlane.xlu0 %752 }
 0x3ef   :  { %1963 = vrsqrt.f32 %v753_v20 }
 0x3fc   :  { %v1964_v28 = vpop.eup %1963 }
 0x3fd   :  { %v2485_v49 = vmul.f32 %v1964_v28, %v2467_v47 }
 0x3ff   :  { %v771_v54 = vsel %vm747_vm6, %v2485_v49, 0  ;;  %v760_v11 = vmul.f32 %v758_v1, %v2485_v49 }
 0x400   :  { %v802_v19 = vand.u32 4294901760, %v771_v54 }
 0x401   :  { %v765_v16 = vsel %vm747_vm6, %v760_v11, 0 }
 0x402   :  { %1892 = vmatprep.subr.mxu1 %v802_v19  ;;  %v890_v18 = vsub.f32 %v771_v54, %v802_v19  ;;  %v850_v33 = vand.u32 4294901760, %v765_v16 }
 0x403   :  { %1893 = vmatpush3.xpose.msra.mxu1 %v802_v19 }
 0x404   :  { %1906 = vmatprep.subr.mxu0 %v890_v18  ;;  %1894 = vmatprep.subr.mxu1 %v805_v32  ;;  %v851_v50 = vsub.f32 %v765_v16, %v850_v33  ;;  %v891_v53 = vand.u32 4294901760, %v890_v18 }
 0x405   :  { %1907 = vmatpush3.xpose.msra.mxu0 %v890_v18 }
 0x406   :  { %1908 = vmatprep.subr.mxu0 %v897_v26  ;;  %v892_v62 = vsub.f32 %v890_v18, %v891_v53  ;;  %v852_v4 = vand.u32 4294901760, %v851_v50 }
 0x407   :  { %1895 = vmatpush3.xpose.msra.mxu1 %v805_v32 }
 0x408   :  { %v893_v5 = vand.u32 4294901760, %v892_v62  ;;  %v853_v10 = vsub.f32 %v851_v50, %v852_v4 }
 0x409   :  { %1909 = vmatpush3.xpose.msra.mxu0 %v897_v26 }
 0x40a   :  { %1899 = vmatprep.subr.mxu1 %v893_v5  ;;  %1920 = vmatprep.subr.mxu0 %v891_v53  ;;  %v854_v27 = vand.u32 4294901760, %v853_v10 }
 0x40c   :  { %1897 = vmatmul.mubr.f32.vlgmr.msra.gmra.mxu1 %v854_v27  ;;  %1911 = vmatmul.mubr.f32.vlgmr.msra.gmra.mxu0 %v851_v50  ;;  %v2543_v27 = vld [vmem:[%s2574_s2] sm:$0xff] }
 0x40d   :  { %1900 = vmatpush3.xpose.msra.mxu1 %v893_v5  ;;  %1903 = vmatprep.mubr.f32.mxu1 %v2480_v7 }
 0x40e   :  { %1901 = vmatprep.subr.mxu1 %v900_v48  ;;  %1921 = vmatpush3.xpose.msra.mxu0 %v891_v53 }
 0x40f   :  { %1924 = vmatprep.mubr.f32.mxu0 %v2480_v7  ;;  %1922 = vmatprep.subr.mxu0 %v898_v57 }
 0x411   :  { %1902 = vmatpush3.xpose.msra.mxu1 %v900_v48 }
 0x412   :  { %1913 = vmatprep.subr.mxu1 %v802_v19  ;;  %1923 = vmatpush3.xpose.msra.mxu0 %v898_v57 }
 0x413   :  { %1934 = vmatprep.subr.bf16.mxu0 %v2020_v22 }
 0x414   :  { %1904 = vmatmul.mubr.f32.vlgmr.msra.gmra.mxu1 %v850_v33 }
 0x415   :  { %1914 = vmatpush3.xpose.msra.mxu1 %v802_v19  ;;  %1917 = vmatprep.mubr.f32.mxu1 %v842_v12  ;;  %v2023_v12 = vmov 0  }
 0x416   :  { %1925 = vmatmul.mubr.f32.vlgmr.msra.gmra.mxu0 %v850_v33  ;;  %1915 = vmatprep.subr.mxu1 %v805_v32 }
 0x417   :  { %1935 = vmatpush3.bf16.msra.mxu0 %v1959_v55  ;;  %1938 = vmatprep.mubr.msk.bf16.mxu0 %vm2021_vm4, %v2020_v22 }
 0x418   :  { %1936 = vmatprep.subr.bf16.mxu0 %v2020_v22  ;;  %1958 = vset.pattern.permute.xlu0 %v2023_v12 }
 0x419   :  { %1916 = vmatpush3.xpose.msra.mxu1 %v805_v32 }
 0x41a   :  { %1927 = vmatprep.subr.mxu1 %v802_v19 }
 0x41b   :  { %1937 = vmatpush3.bf16.msra.mxu0 %v1960_v56 }
 0x41c   :  { %1918 = vmatmul.mubr.f32.vlgmr.msra.gmra.mxu1 %v852_v4 }
 0x41d   :  { %1928 = vmatpush3.xpose.msra.mxu1 %v802_v19  ;;  %1931 = vmatprep.mubr.f32.mxu1 %v2480_v7 }
 0x41e   :  { %1939 = vmatmul.mubr.msk.bf16.vlgmr.msra.gmra.mxu0 %vm747_vm6, %v1336_v58  ;;  %1929 = vmatprep.subr.mxu1 %v805_v32  ;;  %v1314_v58 = vmul.f32 %v2476_v3, %v2485_v49 }
 0x421   :  { %1930 = vmatpush3.xpose.msra.mxu1 %v805_v32 }
 0x424   :  { %1932 = vmatmul.mubr.f32.vlgmr.msra.gmra.mxu1 %v850_v33 }
 0x4cc   :  { %v1898_v9 = vpop.f32.mrf.mxu1  ;;  %v1912_v2 = vpop.f32.mrf.mxu0 }
 0x4ce   :  { %v846_v59 = vpop.f32.mrf.mxu1  ;;  %v1019_v24 = vpop.f32.mrf.mxu0 }
 0x4d4   :  { %v1905_v61 = vpop.f32.mrf.mxu1 }
 0x4d5   :  { %v944_v30 = vadd.f32 %v1905_v61, %v1898_v9  ;;  %v1315_v9 = vsel %vm747_vm6, %v1314_v58, 0.0 }
 0x4d6   :  { %v1926_v25 = vpop.f32.mrf.mxu0  ;;  %v937_v29 = vpop.f32.mrf.mxu1 }
 0x4d7   :  { %v938_v31 = vadd.f32 %v937_v29, %v846_v59  ;;  %v1027_v36 = vadd.f32 %v1912_v2, %v944_v30 }
 0x4d8   :  { %v1186_v34 = vpop.f32.mrf.mxu0 }
 0x4d9   :  { %v1020_v41 = vadd.f32 %v1019_v24, %v938_v31 }
 0x4dc   :  { %v1919_v23 = vpop.f32.mrf.mxu1 }
 0x4dd   :  { %v1110_v39 = vadd.f32 %v1919_v23, %v1027_v36 }
 0x4de   :  { %v1397_v37 = vpop.f32.mrf.mxu0  ;;  %v1101_v38 = vpop.f32.mrf.mxu1 }
 0x4df   :  { %v2510_v40 = vadd.f32 %v1546_v35, %v1397_v37  ;;  %v1102_v43 = vadd.f32 %v1101_v38, %v1020_v41  ;;  %v1193_v46 = vadd.f32 %v1926_v25, %v1110_v39 }
 0x4e0   :  { %v1940_v42 = vpop.f32.mrf.mxu0 }
 0x4e1   :  { %1411 = vmax.xlane.f32.xlu0 %v2510_v40  ;;  %v1187_v60 = vadd.f32 %v1186_v34, %v1102_v43 }
 0x4e2   :  { %v1400_v44 = vpop.f32.mrf.mxu0 }
 0x4e3   :  { %v2513_v45 = vadd.f32 %v1546_v35, %v1400_v44 }
 0x4e4   :  { %v1941_v47 = vpop.f32.mrf.mxu0  ;;  %v1933_v51 = vpop.f32.mrf.mxu1 }
 0x4e5   :  { %1413 = vmax.xlane.f32.xlu1 %v2513_v45  ;;  %v1272_v52 = vadd.f32 %v1933_v51, %v1193_v46 }
 0x4e6   :  { %v1265_v63 = vpop.f32.mrf.mxu1 }
 0x4e7   :  { %v1266_v0 = vadd.f32 %v1265_v63, %v1187_v60  ;;  %v1289_v1 = vsel %vm1283_vm7, %v1272_v52, -inf }
 0x4e8   :  { %v1293_v6 = vsel %vm47_vm0, %v1289_v1, -inf }
 0x4e9   :  { %1294 = vmax.xlane.f32.xlu1 %v1293_v6  ;;  %v1288_v7 = vsel %vm1278_vm8, %v1266_v0, -inf }
 0x4ea   :  { %v1290_v8 = vsel %vm47_vm0, %v1288_v7, -inf }
 0x4eb   :  { %1291 = vmax.xlane.f32.xlu0 %v1290_v8 }
 0x56a   :  { %v2520_v14 = vpop.xlane.xlu0 %1411 }
 0x56b   :  { %v1415_v15 = vsub.f32 %v2510_v40, %v2520_v14  ;;  %vm1454_vm9 = vcmp.eq.f32.partialorder %v2510_v40, %v2520_v14 }
 0x56c   :  { %v1456_v20 = vsel %vm1454_vm9, %v2073_v13, 128 }
 0x56d   :  { %v1417_v21 = vmul.f32 1.442695, %v1415_v15  ;;  %v1459_v28 = vshra.s32 %v1456_v20, 16  ;;  %v1458_v24 = vand.u32 65535, %v1456_v20 }
 0x56e   :  { %v2527_v32 = vpop.xlane.xlu1 %1413 }
 0x56f   :  { %1965 = vpow2.f32 %v1417_v21  ;;  %v1416_v54 = vsub.f32 %v2513_v45, %v2527_v32  ;;  %vm1455_vm10 = vcmp.eq.f32.partialorder %v2513_v45, %v2527_v32  ;;  %v1461_v11 = vcvt.s32.f32 %v1459_v28 }
 0x570   :  { %v1457_v19 = vsel %vm1455_vm10, %v2073_v13, 128  ;;  %v1460_v30 = vcvt.s32.f32 %v1458_v24 }
 0x571   :  { %v1419_v26 = vmul.f32 1.442695, %v1416_v54  ;;  %1462 = vmin.xlane.f32.xlu0 %v1461_v11  ;;  %v1473_v16 = vshra.s32 %v1457_v19, 16  ;;  %v1472_v31 = vand.u32 65535, %v1457_v19 }
 0x572   :  { %v2534_v18 = vpop.xlane.xlu1 %1294 }
 0x573   :  { %1967 = vpow2.f32 %v1419_v26  ;;  %v1297_v33 = vsub.f32 %v1289_v1, %v2534_v18  ;;  %v1475_v50 = vcvt.s32.f32 %v1473_v16  ;;  %v1474_v3 = vcvt.s32.f32 %v1472_v31 }
 0x574   :  { %v2537_v53 = vpop.xlane.xlu0 %1291 }
 0x575   :  { %v1300_v57 = vmul.f32 1.442695, %v1297_v33  ;;  %1476 = vmin.xlane.f32.xlu1 %v1475_v50  ;;  %v1296_v62 = vsub.f32 %v1288_v7, %v2537_v53 }
 0x577   :  { %1969 = vpow2.f32 %v1300_v57  ;;  %v1298_v4 = vmul.f32 1.442695, %v1296_v62 }
 0x579   :  { %1971 = vpow2.f32 %v1298_v4 }
 0x57c   :  { %v1966_v5 = vpop.eup %1965 }
 0x57d   :  { %1421 = vadd.xlane.f32.xlu1 %v1966_v5 }
 0x580   :  { %v1968_v10 = vpop.eup %1967 }
 0x581   :  { %1423 = vadd.xlane.f32.xlu1 %v1968_v10 }
 0x584   :  { %v1970_v17 = vpop.eup %1969 }
 0x585   :  { %v1305_v48 = vsel %vm47_vm0, %v1970_v17, 0.0 }
 0x586   :  { %v1972_v55 = vpop.eup %1971  ;;  %1306 = vadd.xlane.f32.xlu1 %v1305_v48 }
 0x587   :  { %1406 = vperm.xlu0 %1958, %v2543_v27   ;;  %v1302_v56 = vsel %vm47_vm0, %v1972_v55, 0.0 }
 0x58a   :  { %1303 = vadd.xlane.f32.xlu1 %v1302_v56 }
 0x58e   :  { %1316 = vadd.xlane.f32.xlu1 %v1315_v9 }
 0x5fa   :  { %v1463_v2 = vpop.xlane.xlu0 %1462 }
 0x5fb   :  { %vm1464_vm12 = vcmp.eq.f32.partialorder %v1461_v11, %v1463_v2  ;;  %v1469_v41 = vcvt.f32.s32 %v1463_v2 }
 0x5fc   :  { %v1465_v34 = vsel %vm1464_vm12, %v1460_v30, inf }
 0x5fd   :  { %v1470_v47 = vshll.u32 %v1469_v41, 16 }
 0x5fe   :  { %v1477_v29 = vpop.xlane.xlu1 %1476 }
 0x5ff   :  { %vm1478_vm13 = vcmp.eq.f32.partialorder %v1475_v50, %v1477_v29  ;;  %v1483_v6 = vcvt.f32.s32 %v1477_v29 }
 0x600   :  { %v1479_v49 = vsel %vm1478_vm13, %v1474_v3, inf }
 0x601   :  { %v1484_v19 = vshll.u32 %v1483_v6, 16 }
 0x602   :  { %v1407_v59 = vpop.permute.xlu0 %1406 }
 0x603   :  { %vm1408_vm11 = vcmp.eq.s32.totalorder %v2073_v13, %v1407_v59 }
 0x604   :  { %v1550_v61 = vsel %vm1408_vm11, 1.0, %v2020_v22 }
 0x605   :  { %v1431_v25 = vmul.f32 %v1550_v61, %v2510_v40  ;;  %v1432_v23 = vmul.f32 %v1550_v61, %v2513_v45 }
 0x606   :  { %v1422_v13 = vpop.xlane.xlu1 %1421 }
 0x607   :  { %1433 = vadd.xlane.f32.xlu1 %v1431_v25  ;;  %1973 = vlog2.f32 %v1422_v13 }
 0x60a   :  { %v1424_v35 = vpop.xlane.xlu1 %1423 }
 0x60b   :  { %1466 = vmin.xlane.f32.xlu1 %v1465_v34 }
 0x60f   :  { %1480 = vmin.xlane.f32.xlu1 %v1479_v49  ;;  %v1307_v36 = vpop.xlane.xlu1 %1306 }
 0x613   :  { %1435 = vadd.xlane.f32.xlu1 %v1432_v23  ;;  %v1304_v37 = vpop.xlane.xlu1 %1303 }
 0x614   :  { %1975 = vlog2.f32 %v1304_v37  ;;  %v1974_v40 = vpop.eup %1973 }
 0x615   :  { %1977 = vlog2.f32 %v1424_v35  ;;  %v1426_v51 = vmul.f32 0.6931472, %v1974_v40 }
 0x616   :  { %1979 = vlog2.f32 %v1307_v36 }
 0x617   :  { %v1317_v38 = vpop.xlane.xlu1 %1316  ;;  %v1429_v8 = vadd.f32 %v1426_v51, %v2520_v14 }
 0x621   :  { %v1976_v42 = vpop.eup %1975 }
 0x622   :  { %v1978_v43 = vpop.eup %1977  ;;  %v1309_v45 = vmul.f32 0.6931472, %v1976_v42 }
 0x623   :  { %v1980_v44 = vpop.eup %1979  ;;  %v1428_v60 = vmul.f32 0.6931472, %v1978_v43 }
 0x624   :  { %v1311_v63 = vmul.f32 0.6931472, %v1980_v44  ;;  %v1312_v7 = vadd.f32 %v1309_v45, %v2537_v53 }
 0x625   :  { %v1430_v15 = vadd.f32 %v1428_v60, %v2527_v32 }
 0x626   :  { %v1313_v20 = vadd.f32 %v1311_v63, %v2534_v18  ;;  %v1318_v26 = vsub.f32 %v1312_v7, %v1317_v38 }
 0x628   :  { %v1319_v33 = vsub.f32 %v1313_v20, %v1317_v38  ;;  %v1321_v32 = vsel %vm1320_vm15, %v1318_v26, 0.0 }
 0x62a   :  { %v1322_v18 = vsel %vm1320_vm15, %v1319_v33, 0.0 }
 0x62b   :  { %v1323_v62 = vadd.f32 %v1322_v18, %v1321_v32 }
 0x690   :  { %v1434_v39 = vpop.xlane.xlu1 %1433 }
 0x691   :  { %v1437_v21 = vsub.f32 %v1429_v8, %v1434_v39 }
 0x693   :  { %v1439_v50 = vsel %vm1320_vm15, %v1437_v21, 0.0 }
 0x694   :  { %v1467_v46 = vpop.xlane.xlu1 %1466 }
 0x695   :  { %v1468_v52 = vcvt.f32.s32 %v1467_v46 }
 0x697   :  { %v1471_v0 = vadd.s32 %v1470_v47, %v1468_v52 }
 0x698   :  { %v1481_v1 = vpop.xlane.xlu1 %1480 }
 0x699   :  { %vm1486_vm14 = vcmp.eq.s32.totalorder %v1471_v0, %v2543_v27  ;;  %v1482_v28 = vcvt.f32.s32 %v1481_v1 }
 0x69a   :  { %v1551_v12 = vsel %vm1486_vm14, 1.0, %v2020_v22 }
 0x69b   :  { %v1492_v54 = vsel %vm1320_vm15, %v1551_v12, 0.0  ;;  %v1485_v14 = vadd.s32 %v1484_v19, %v1482_v28 }
 0x69c   :  { %1493 = vadd.xlane.f32.xlu0 %v1492_v54  ;;  %v1436_v11 = vpop.xlane.xlu1 %1435 }
 0x69d   :  { %v1438_v16 = vsub.f32 %v1430_v15, %v1436_v11  ;;  %vm1487_vm0 = vcmp.eq.s32.totalorder %v1485_v14, %v2543_v27 }
 0x69e   :  { %v1552_v4 = vsel %vm1487_vm0, 1.0, %v2020_v22 }
 0x69f   :  { %v1440_v53 = vsel %vm1320_vm15, %v1438_v16, 0.0  ;;  %v1505_v5 = vsel %vm1320_vm15, %v1552_v4, 0.0 }
 0x6a0   :  { %v1441_v57 = vadd.f32 %v1440_v53, %v1439_v50 }
 0x6a2   :  { %1442 = vadd.xlane.f32.xlu1 %v1441_v57 }
 0x6a6   :  { %1324 = vadd.xlane.f32.xlu1 %v1323_v62 }
 0x6aa   :  { %1506 = vadd.xlane.f32.xlu1 %v1505_v5 }
 0x725   :  { %v1494_v10 = vpop.xlane.xlu0 %1493 }
 0x726   :  { %v1495_v17 = vrot.slane %v1494_v10, 4 }
 0x728   :  { %v1496_v55 = vadd.f32 %v1495_v17, %v1494_v10 }
 0x72a   :  { %v1497_v2 = vrot.slane %v1496_v55, 2 }
 0x72b   :  { %v1443_v48 = vpop.xlane.xlu1 %1442 }
 0x72c   :  { %v1444_v56 = vrot.slane %v1443_v48, 4  ;;  %v1498_v29 = vadd.f32 %v1497_v2, %v1496_v55 }
 0x72e   :  { %v1445_v58 = vadd.f32 %v1444_v56, %v1443_v48  ;;  %v1499_v13 = vrot.slane %v1498_v29, 1 }
 0x72f   :  { %v1325_v9 = vpop.xlane.xlu1 %1324 }
 0x730   :  { %v1446_v59 = vrot.slane %v1445_v58, 2  ;;  %v1326_v61 = vrot.slane %v1325_v9, 4  ;;  %v1500_v38 = vadd.f32 %v1499_v13, %v1498_v29 }
 0x732   :  { %v1327_v24 = vadd.f32 %v1326_v61, %v1325_v9  ;;  %v1447_v27 = vadd.f32 %v1446_v59, %v1445_v58 }
 0x733   :  { %v1507_v25 = vpop.xlane.xlu1 %1506 }
 0x734   :  { %v1328_v30 = vrot.slane %v1327_v24, 2  ;;  %v1508_v31 = vrot.slane %v1507_v25, 4  ;;  %v1448_v3 = vrot.slane %v1447_v27, 1 }
 0x736   :  { %v1509_v22 = vadd.f32 %v1508_v31, %v1507_v25  ;;  %v1329_v34 = vadd.f32 %v1328_v30, %v1327_v24  ;;  %v1449_v37 = vadd.f32 %v1448_v3, %v1447_v27 }
 0x738   :  { %v1510_v49 = vrot.slane %v1509_v22, 2  ;;  %v1330_v23 = vrot.slane %v1329_v34, 1 }
 0x73a   :  { %v1511_v35 = vadd.f32 %v1510_v49, %v1509_v22  ;;  %v1331_v36 = vadd.f32 %v1330_v23, %v1329_v34 }
 0x73c   :  { %1942 = vpush %v1331_v36  ;;  %v1512_v39 = vrot.slane %v1511_v35, 1 }
 0x73d   :  { %1944 = vpush %v1449_v37 }
 0x73e   :  { %1946 = vpush %v1500_v38  ;;  %v1513_v40 = vadd.f32 %v1512_v39, %v1511_v35 }
 0x740   :  { %1948 = vpush %v1513_v40 }
 0x76d   :  { %s1943_s18 = spop %1942 }
 0x76e   :  { %s1335_s19 = smul.f32 0.0625, %s1943_s18  ;;  %s1945_s20 = spop %1944 }
 0x76f   :  { %s1453_s21 = smul.f32 0.0625, %s1945_s20  ;;  %s1947_s22 = spop %1946 }
 0x770   :  { %1519 = sst [smem:[#allocation6]] %s1335_s19  ;;  %s1504_s23 = smul.f32 0.125, %s1947_s22 }
 0x771   :  { %1521 = sst [smem:[#allocation6 + $0x1]] %s1453_s21  ;;  %s1949_s24 = spop %1948 }
 0x772   :  { %1523 = sst [smem:[#allocation6 + $0x2]] %s1504_s23  ;;  %s1517_s25 = smul.f32 0.125, %s1949_s24 }
 0x774   :  { %1525 = sst [smem:[#allocation6 + $0x3]] %s1517_s25 }
 0x775   :  { %2012 = shalt.err (!%p2009_p9)
}
 0x776   :  { %s2024_s7 = smov [#allocation6]  }
 0x777   :  { %1535 = dma.smem_to_vmem %s2024_s7, 16, %s1533_s17, [#allocation5]  }
 0x778   :  { %2015 = dma.done.wait [#allocation5], 16  }
 0x779   :  { %2016 = vsyncadd [#allocation5], 4294967280 }
 0x77a   :  { %1539 = sfence }
 0x77b   :  { %1540 = vsyncpa [#allocation4], 1 }
 0x77c   :  { %1541 = vsyncpa [#allocation5], 1 }

</bundles_post_ra>
